<compile_context>
chip_gen: v7x
topology: tpu7x:2x2x1
jax: 0.10.0
libtpu: 0.0.40
codegen_flags: <defaults>
</compile_context>

<pallas_src>
import functools

import jax
import jax.numpy as jnp
from jax.experimental import pallas as pl
from jax.experimental.pallas import tpu as pltpu


def _select_k_kernel(x_ref, o_ref, *, k, inv_temperature):
    # One (tile_rows, A) tile per grid step; full attribute axis in VMEM.
    x = x_ref[...].astype(jnp.float32)
    m = jnp.max(x, axis=-1, keepdims=True)        # XLU cross-lane reduce
    z = x - m
    if inv_temperature != 1.0:                    # compile-time constant
        z = z * inv_temperature                   # softmax(x/T): max commutes with 1/T > 0
    e = jnp.exp(z)                                # EUP
    s = jnp.sum(e, axis=-1, keepdims=True)        # XLU cross-lane reduce
    # Fold k into the tiny (tile_rows, 1) reciprocal; exact so rows sum to k.
    scale = k * pl.reciprocal(s, approx=False)
    o_ref[...] = (e * scale).astype(o_ref.dtype)


def _round_up(x: int, m: int) -> int:
    return ((x + m - 1) // m) * m


# Minimum sublane packing per element size (f32 -> 8, bf16 -> 16, int8/fp8 -> 32).
_SUBLANE_BY_ITEMSIZE = {4: 8, 2: 16, 1: 32}

# Minimum grid steps (when N permits): keeps the DMA/compute pipeline deep and
# gives both v7x TensorCores work under dimension_semantics=("parallel",).
_MIN_GRID_STEPS = 8


def select_k(attrs: jax.Array, *, k: int = 4, temperature: float = 1.0,
             vmem_budget_bytes: int = 8 * 1024 * 1024) -> jax.Array:
    """diff_fun(attrs) = k * softmax(attrs / temperature, axis=-1)."""
    n, a = attrs.shape
    dtype = attrs.dtype
    itemsize = jnp.dtype(dtype).itemsize
    sublane = _SUBLANE_BY_ITEMSIZE.get(itemsize, 8)

    # VMEM footprint per row of a block:
    #   in + out, double buffered, in the I/O dtype  -> 4 * itemsize
    #   compiler-managed f32 temporaries (x, e)      -> 2 * 4
    # Lanes are physically padded to a multiple of 128 regardless of A.
    a_lanes = _round_up(max(a, 1), 128)
    bytes_per_row = a_lanes * (4 * itemsize + 2 * 4)
    tile_max = max(sublane,
                   (vmem_budget_bytes // bytes_per_row) // sublane * sublane)

    # Balanced row tiles: at least enough tiles to respect the VMEM budget,
    # and at least _MIN_GRID_STEPS when N has that many sublane-rows.
    num_tiles = max(pl.cdiv(n, tile_max),
                    min(_MIN_GRID_STEPS, pl.cdiv(n, sublane)))
    tile_rows = _round_up(pl.cdiv(n, num_tiles), sublane)
    grid = pl.cdiv(n, tile_rows)

    kernel = functools.partial(
        _select_k_kernel, k=float(k), inv_temperature=1.0 / float(temperature))

    # No wrapper padding:
    #  * last (lane) block dim == full A  -> exempt from the 128 rule; Mosaic
    #    masks the lane tail internally, reductions over axis -1 see only A.
    #  * row axis uses cdiv(n, tile_rows); OOB rows of the final block read
    #    unspecified data but their writes are dropped, and every op is
    #    row-independent, so valid rows are unaffected.
    out = pl.pallas_call(
        kernel,
        out_shape=jax.ShapeDtypeStruct((n, a), dtype),
        grid_spec=pltpu.PrefetchScalarGridSpec(
            num_scalar_prefetch=0,
            grid=(grid,),
            in_specs=[pl.BlockSpec((tile_rows, a), lambda i: (i, 0))],
            out_specs=pl.BlockSpec((tile_rows, a), lambda i: (i, 0)),
        ),
        compiler_params=pltpu.CompilerParams(
            # Rows are fully independent -> shard grid across TCs on v7x
            # megacore; no-op on single-TC v5e/v6e.
            dimension_semantics=("parallel",),
            # Above v5e's 16 MiB scoped default, safely below every chip's
            # physical VMEM (64 MiB v7x / 128 MiB v5e-v6e).
            vmem_limit_bytes=32 * 1024 * 1024,
        ),
    )(attrs)
    return out


if __name__ == "__main__":
    key = jax.random.PRNGKey(0)
    key_a, key_b = jax.random.split(key)

    # Small shape consistent with the module: 16 items x 256 attributes.
    attrs = jax.random.normal(key_a, (16, 256), dtype=jnp.float32)
    out = jax.block_until_ready(select_k(attrs, k=4, temperature=1.0))
    ref = 4.0 * jax.nn.softmax(attrs / 1.0, axis=-1)
    assert out.shape == attrs.shape and out.dtype == attrs.dtype
    assert jnp.allclose(out, ref, atol=1e-5, rtol=1e-4)

    # Ragged shape: N not a multiple of the tile, A not a multiple of 128.
    attrs2 = jax.random.normal(key_b, (300, 200), dtype=jnp.float32)
    out2 = jax.block_until_ready(select_k(attrs2, k=4, temperature=0.5))
    ref2 = 4.0 * jax.nn.softmax(attrs2 / 0.5, axis=-1)
    assert out2.shape == attrs2.shape and out2.dtype == attrs2.dtype
    assert jnp.allclose(out2, ref2, atol=1e-5, rtol=1e-4)

    print("KERNEL_OK")
</pallas_src>

<mosaic_0001>
module attributes {stable_mosaic.version = 11 : i64} {
  func.func @_select_k_kernel(%arg0: i32, %arg1: memref<8x256xf32, #tpu.memory_space<vmem>>, %arg2: memref<8x256xf32, #tpu.memory_space<vmem>>) attributes {dimension_semantics = [#tpu.dimension_semantics<parallel>], iteration_bounds = array<i64: 2>, scalar_prefetch = 0 : i64, scratch_operands = 0 : i64, tpu.core_type = #tpu.core_type<tc>, window_params = [{transform_indices = @transform_0, window_bounds = array<i64: 8, 256>}, {transform_indices = @transform_1, window_bounds = array<i64: 8, 256>}]} {
    %c0 = arith.constant 0 : index
    %c0_0 = arith.constant 0 : index
    %0 = vector.load %arg1[%c0, %c0_0] : memref<8x256xf32, #tpu.memory_space<vmem>>, vector<8x256xf32>
    %cst = arith.constant dense<0xFF800000> : vector<8xf32>
    %1 = vector.multi_reduction <maximumf>, %0, %cst [1] : vector<8x256xf32> to vector<8xf32>
    %2 = vector.shape_cast %1 : vector<8xf32> to vector<8x1xf32>
    %3 = vector.broadcast %2 : vector<8x1xf32> to vector<8x256xf32>
    %4 = arith.subf %0, %3 : vector<8x256xf32>
    %5 = math.exp %4 : vector<8x256xf32>
    %cst_1 = arith.constant dense<0.000000e+00> : vector<8xf32>
    %6 = vector.multi_reduction <add>, %5, %cst_1 [1] : vector<8x256xf32> to vector<8xf32>
    %7 = vector.shape_cast %6 : vector<8xf32> to vector<8x1xf32>
    %8 = tpu.reciprocal %7 : vector<8x1xf32> -> vector<8x1xf32>
    %cst_2 = arith.constant 4.000000e+00 : f32
    %9 = vector.broadcast %cst_2 : f32 to vector<8x1xf32>
    %10 = arith.mulf %9, %8 : vector<8x1xf32>
    %11 = vector.broadcast %10 : vector<8x1xf32> to vector<8x256xf32>
    %12 = arith.mulf %5, %11 : vector<8x256xf32>
    %c0_3 = arith.constant 0 : index
    %c0_4 = arith.constant 0 : index
    %13 = vector.load %arg2[%c0_3, %c0_4] : memref<8x256xf32, #tpu.memory_space<vmem>>, vector<8x256xf32>
    tpu.vector_store %arg2[%c0_3, %c0_4], %12 {strides = array<i32>} : memref<8x256xf32, #tpu.memory_space<vmem>>, vector<8x256xf32>,
    return
  }
  func.func @transform_0(%arg0: i32) -> (i32, i32) {
    %c0_i32 = arith.constant 0 : i32
    %c0_i32_0 = arith.constant 0 : i32
    return %arg0, %c0_i32 : i32, i32
  }
  func.func @transform_1(%arg0: i32) -> (i32, i32) {
    %c0_i32 = arith.constant 0 : i32
    %c0_i32_0 = arith.constant 0 : i32
    return %arg0, %c0_i32 : i32, i32
  }
}

</mosaic_0001>

<bundles_post_ra>
// kernel: tpu_custom_call.1
= control target key start
LH: loop header
LB: loop body
LE: loop exit
PB: predicated region body
PF: predicated region fallthrough
CT: control target
= control target key end

     0   :  { %6 = vsyncpa [#allocation3], 0  ;;  %s577_s0 = inlined_call_operand.hbm [shape: f32[16,256], index: 0, kind: input, shape index: {}]   ;;  %s578_s1 = inlined_call_operand.hbm [shape: f32[16,256], index: 1, kind: output, shape index: {}]  }
   0x1   :  { %8 = vsyncpa [#allocation3 + $0x1], 0 }
   0x2   :  { %9 = vsyncpa [#allocation4], 0 }
   0x3   :  { %11 = vsyncpa [#allocation4 + $0x1], 0  ;;  %s416_s6 = smov 0   ;;  %s418_s7 = smov 0  }
   0x4   :  { %s420_s8 = smov 0   ;;  %s422_s9 = smov 0  }
   0x5 LB: > { %s437_s10 = sadd.s32 4294967295, %s402_s9   ;;  %s238_s11 = sadd.s32 4294967294, %s402_s9   ;;  %s402_s9 = sphi %s422_s9, %s593_s9   ;;  %s398_s8 = sphi %s420_s8, %s592_s8   ;;  %s394_s7 = sphi %s418_s7, %s591_s7   ;;  %s390_s6 = sphi %s416_s6, %s590_s6  }
   0x6   : > { %s441_s12 = sadd.s32 1, %s402_s9   ;;  %s24_s13 = sadd.s32 1, %s398_s8 }
   0x7   : > { %s21_s14 = ssub.s32 %s402_s9, %s441_s12  ;;  %p31_p0 = scmp.ne.s32.totalorder %s398_s8, %s394_s7 }
   0x8   : > { %p22_p1 = scmp.eq.s32.totalorder %s21_s14, 0  ;;  %p32_p2 = scmp.eq.s32.totalorder %s402_s9, 0 }
   0x9   : > { %p37_p3 = scmp.ne.s32.totalorder %s394_s7, %s390_s6  ;;  %p38_p4 = scmp.eq.s32.totalorder %s437_s10, 0 }
   0xa   : > { %s453_s15 = scalar_select %p22_p1, %s398_s8, %s24_s13  }
   0xb   : > { %p455_p5 = por %p32_p2, %p31_p0  ;;  %p459_p6 = por %p38_p4, %p37_p3 }
   0xc   : > { %p61_p7 = scmp.eq.s32.totalorder %s437_s10, 1  ;;  %p67_p8 = scmp.eq.s32.totalorder %s238_s11, 1 }
   0xd   : > { %p266_p10 = scmp.lt.s32.totalorder %s402_s9, 2  ;;  %s87_s20 = sand.u32 1, %s398_s8  }
   0xe   : > { %p466_p11 = por %p61_p7, %p31_p0  ;;  %p470_p12 = por %p67_p8, %p37_p3 }
   0xf   : > { %s252_s21 = sshll.u32 %s402_s9, 8  ;;  %s241_s22 = sshll.u32 %s87_s20, 4 }
  0x10   : > { %s582_s18 = scalar_select %p466_p11, 1, 0 }
  0x11   : > { %s583_s19 = scalar_select %p470_p12, 1, 0 }
  0x12   : > { %s479_s25 = scalar_lea.hbm %s577_s0, %s252_s21  ;;  %s91_s26 = scalar_lea.vmem [#allocation2], %s241_s22 }
  0x13   : > { %s99_s27 = sshll.u32 %s91_s26, 4  ;;  %p483_p13 = pnand %p266_p10, %p455_p5  ;;  %s487_s27 = int_to_ptr.vmem [resolvable:$true] %s99_s27 }
  0x14   : > { %s88_s29 = scalar_lea.sflag [#allocation3], %s87_s20  ;;  %s306_s30 = scalar_lea.hbm %s479_s25, 256 }
  0x15   : > { %p307_p2 = scmp.ne.s32.totalorder %s479_s25, %s306_s30  ;;  %p308_p3 = pneg %p483_p13 }
  0x16   : > { %s311_s4 = scalar_lea.hbm %s577_s0, 512  ;;  %p312_p5 = scmp.lt.u32.totalorder %s479_s25, %s577_s0 }
  0x17   : > { %p309_p4 = pnand %p308_p3, %p307_p2  ;;  %p313_p8 = scmp.lt.u32.totalorder %s311_s4, %s306_s30 }
  0x18   : > { %p315_p9 = scmp.lt.u32.totalorder %s306_s30, %s479_s25 }
  0x19   : > { %p310_p7 = pneg %p309_p4  ;;  %p314_p10 = por %p313_p8, %p312_p5 }
  0x1b   : > { %p316_p0 = por %p315_p9, %p314_p10 }
  0x1d   : > { %p317_p1 = pnand %p316_p0, %p310_p7 }
  0x1f   : > { %320 = shalt.err (!%p317_p1)
}
  0x20   : > { %s321_s13 = scalar_lea.vmem %s487_s27, 256  ;;  %s404_s14 = smov [#allocation2]  }
  0x21   : > { %p322_p2 = scmp.ne.s32.totalorder %s487_s27, %s321_s13  ;;  %s326_s16 = sshll.u32 %s404_s14, 4  ;;  %s327_s16 = int_to_ptr.vmem [resolvable:$false] %s326_s16 }
  0x22   : > { %s328_s20 = scalar_lea.vmem %s327_s16, 512  ;;  %p329_p11 = scmp.lt.s32.totalorder %s487_s27, %s327_s16 }
  0x23   : > { %p324_p4 = pnand %p322_p2, %p308_p3  ;;  %p330_p5 = scmp.lt.s32.totalorder %s328_s20, %s321_s13 }
  0x25   : > { %p325_p12 = pneg %p324_p4  ;;  %p331_p8 = por %p330_p5, %p329_p11 }
  0x27   : > { %p332_p9 = pnand %p331_p8, %p325_p12 }
  0x29   : > { %335 = shalt.err (!%p332_p9)
}
  0x2a   : > { %261 = dma.hbm_to_vmem [thread:$0]  (!%p483_p13), %s479_s25, 256, %s487_s27, %s88_s29  }
  0x2b   : > { %p585_p0 = scmp.lt.s32.totalorder %s402_s9, 3  ;;  %p586_p1 = scmp.ge.s32.totalorder %s402_s9, 1 }
  0x2d   : > { %p105_p3 = pnand %p586_p1, %p585_p0 }
  0x2e   : > { %s521_s21 = sand.u32 (!%p105_p3), 1, %s394_s7  }
  0x2f   : > { %108 = sbr.rel (%p105_p3) target bundleno = 389 (0x185), region = 24  ;;  %s245_s22 = sshll.u32 (!%p105_p3), %s521_s21, 4 }
  0x30   : > { %s111_s23 = scalar_lea.sflag (!%p105_p3), [#allocation3], %s521_s21  ;;  %s114_s24 = scalar_lea.vmem (!%p105_p3), [#allocation2], %s245_s22 }
  0x36   : > { %381 = dma.done.wait (%p459_p6), %s111_s23, 256  }
  0x37   : > { %383 = vsyncadd (%p459_p6), %s111_s23, 4294967040  ;;  %v133_v0 = vld [vmem:[%s114_s24] sm:$0xff]  ;;  %v134_v1 = vld [vmem:[%s114_s24 + $0x8] sm:$0xff]  ;;  %s253_s17 = sshll.u32 %s437_s10, 8  ;;  %s132_s25 = scalar_lea.vmem [#allocation5], %s245_s22 }
  0x38   : > { %v135_v2 = vmax.f32 %v133_v0, %v134_v1  ;;  %s168_s26 = sshll.u32 %s132_s25, 4  ;;  %s533_s29 = scalar_lea.hbm %s578_s1, %s253_s17  ;;  %s535_s26 = int_to_ptr.vmem [resolvable:$true] %s168_s26 }
  0x39   : > { %s154_s30 = scalar_lea.sflag [#allocation4], %s521_s21  ;;  %s336_s2 = scalar_lea.vmem %s535_s26, 256 }
  0x3a   : > { %136 = vmax.xlane.f32.xlu0 %v135_v2  ;;  %p337_p6 = scmp.ne.s32.totalorder %s535_s26, %s336_s2  ;;  %p587_p11 = scmp.ne.s32.totalorder %s582_s18, 0 }
  0x3b   : > { %s405_s10 = smov [#allocation5]  }
  0x3c   : > { %p338_p12 = pnand %p337_p6, %p587_p11  ;;  %s340_s3 = sshll.u32 %s405_s10, 4  ;;  %s341_s3 = int_to_ptr.vmem [resolvable:$false] %s340_s3 }
  0x3d   : > { %s342_s4 = scalar_lea.vmem %s341_s3, 512  ;;  %p343_p7 = scmp.lt.s32.totalorder %s535_s26, %s341_s3 }
  0x3e   : > { %p339_p13 = pneg %p338_p12  ;;  %p344_p10 = scmp.lt.s32.totalorder %s342_s4, %s336_s2 }
  0x40   : > { %p345_p2 = por %p344_p10, %p343_p7 }
  0x42   : > { %p346_p4 = pnand %p345_p2, %p339_p13 }
  0xc7   : > { %v137_v3 = vpop.xlane.xlu0 %136 }
  0xc8   : > { %v138_v4 = vsub.f32 %v133_v0, %v137_v3  ;;  %v139_v5 = vsub.f32 %v134_v1, %v137_v3 }
  0xca   : > { %v140_v6 = vmul.f32 1.442695, %v138_v4  ;;  %v142_v7 = vmul.f32 1.442695, %v139_v5 }
  0xcc   : > { %300 = vpow2.f32 %v140_v6 }
  0xcd   : > { %302 = vpow2.f32 %v142_v7 }
  0xd6   : > { %v301_v8 = vpop.eup %300 }
  0xd7   : > { %v303_v9 = vpop.eup %302 }
  0xd8   : > { %v144_v10 = vadd.f32 %v303_v9, %v301_v8 }
  0xda   : > { %145 = vadd.xlane.f32.xlu0 %v144_v10 }
 0x167   : > { %v146_v11 = vpop.xlane.xlu0 %145 }
 0x168   : > { %304 = vrcp.f32 %v146_v11 }
 0x172   : > { %v305_v12 = vpop.eup %304 }
 0x173   : > { %v148_v13 = vmul.f32 4.0, %v305_v12 }
 0x175   : > { %v149_v14 = vmul.f32 %v301_v8, %v148_v13  ;;  %v150_v15 = vmul.f32 %v303_v9, %v148_v13 }
 0x177   : > { %151 = vst [vmem:[%s132_s25] sm:$0xff] %v149_v14  ;;  %152 = vst [vmem:[%s132_s25 + $0x8] sm:$0xff] %v150_v15 }
 0x178   : > { %349 = shalt.err (!%p346_p4)
}
 0x179   : > { %s350_s5 = scalar_lea.hbm %s533_s29, 256  ;;  %s354_s14 = scalar_lea.hbm %s578_s1, 512 }
 0x17a   : > { %p351_p5 = scmp.ne.s32.totalorder %s533_s29, %s350_s5  ;;  %p355_p0 = scmp.lt.u32.totalorder %s533_s29, %s578_s1 }
 0x17b   : > { %p356_p1 = scmp.lt.u32.totalorder %s354_s14, %s350_s5  ;;  %p358_p6 = scmp.lt.u32.totalorder %s350_s5, %s533_s29 }
 0x17c   : > { %p352_p8 = pnand %p351_p5, %p587_p11 }
 0x17d   : > { %p357_p3 = por %p356_p1, %p355_p0 }
 0x17e   : > { %p353_p9 = pneg %p352_p8 }
 0x17f   : > { %p359_p12 = por %p358_p6, %p357_p3 }
 0x181   : > { %p360_p13 = pnand %p359_p12, %p353_p9 }
 0x183   : > { %363 = shalt.err (!%p360_p13)
}
 0x184   : > { %256 = dma.vmem_to_hbm [thread:$0]  (%p587_p11), %s535_s26, 256, %s533_s29, %s154_s30  }
 0x185 PF: > { %s180_s21 = sand.u32 1, %s390_s6   ;;  %p588_p7 = scmp.ne.s32.totalorder %s583_s19, 0 }
 0x186   : > { %p589_p10 = scmp.ge.s32.totalorder %s402_s9, 2  ;;  %s181_s22 = scalar_lea.sflag [#allocation4], %s180_s21 }
 0x188   : > { %p263_p2 = pnand %p589_p10, %p588_p7 }
 0x18a   : > { %385 = dma.done.wait (!%p263_p2), %s181_s22, 256  }
 0x18b   : > { %387 = vsyncadd (!%p263_p2), %s181_s22, 4294967040  ;;  %p14_p4 = scmp.ge.s32.totalorder %s441_s12, 4   ;;  %s590_s6 = smov %s394_s7 }
 0x18c   : > { %s591_s7 = smov %s398_s8  ;;  %s592_s8 = smov %s453_s15 }
 0x18d   : > { %s593_s9 = smov %s441_s12  ;;  %16 = sbr.rel (!%p14_p4) target bundleno = 5 (0x5), region = 69 }
 0x194   :  { %186 = vsyncpa [#allocation3], 1 }
 0x195   :  { %188 = vsyncpa [#allocation3 + $0x1], 1 }
 0x196   :  { %189 = vsyncpa [#allocation4], 1 }
 0x197   :  { %191 = vsyncpa [#allocation4 + $0x1], 1 }

</bundles_post_ra>
